<compile_context>
chip_gen: v7x
topology: tpu7x:2x2x1
jax: 0.10.0
libtpu: 0.0.40
codegen_flags: <defaults>
</compile_context>

<pallas_src>
import functools
import math

import jax
import jax.numpy as jnp
from jax.experimental import pallas as pl
from jax.experimental.pallas import tpu as pltpu

# ---- static module hyper-parameters (from ColorEncoder.__init__ defaults) ----
NET_WIDTH = 64
MULTIRES_COLOR = 4
INPUT_DIM = 3
OUTPUT_DIM = 3
# log-sampled bands: 2 ** linspace(0, multires-1, multires) = [1, 2, 4, 8]
FREQS = tuple(float(2.0 ** e) for e in range(MULTIRES_COLOR))
EMBED_DIM = INPUT_DIM * (1 + 2 * MULTIRES_COLOR)   # 27
K_IN = EMBED_DIM + 1                               # 28: last row = constant 1 (carries b1)
_HALF_PI = math.pi / 2.0

# PyTorch embedding feature order: [c, sin(f0*c), cos(f0*c), sin(f1*c), cos(f1*c), ...].
# The kernel builds the embedding grouped as [c, sin(all f), cos(all f)];
# EMBED_PERM maps grouped row -> PyTorch row so W1 is permuted ONCE in prepare_params.
EMBED_PERM = tuple(
    list(range(INPUT_DIM))
    + [INPUT_DIM + 2 * INPUT_DIM * f + d
       for f in range(MULTIRES_COLOR) for d in range(INPUT_DIM)]          # sin rows
    + [2 * INPUT_DIM + 2 * INPUT_DIM * f + d
       for f in range(MULTIRES_COLOR) for d in range(INPUT_DIM)]          # cos rows
)


def color_encoder_kernel(c_ref, w1_ref, w2_ref, b2_ref, o_ref, *, chunk):
    """Channel-major tile. c_ref: (3, tm) f32, w1_ref: (64, 28) bf16 (last column = b1),
    w2_ref: (3, 64) bf16, b2_ref: (3, 1) f32, o_ref: (3, tm) f32.  tm is the lane axis."""
    num_chunks = c_ref.shape[1] // chunk   # static

    def chunk_body(j, carry):
        col = pl.multiple_of(j * chunk, chunk)
        cols = pl.ds(col, chunk)
        c = c_ref[:, cols]                                                # (3, chunk) f32

        # Positional encoding, grouped [sin(f0..f3 * c); cos(f0..f3 * c)].
        # Frequencies are Python scalars (no captured array constants).
        # cos = sin(x + pi/2): all 24 rows go through ONE fused sin on the EUP.
        scaled = jnp.concatenate([c * f for f in FREQS], axis=0)          # (12, chunk)
        sincos = jnp.sin(jnp.concatenate([scaled, scaled + _HALF_PI], axis=0))  # (24, chunk)
        ones = jnp.ones((1, chunk), dtype=jnp.float32)                    # carries b1 through W1
        emb = jnp.concatenate([c, sincos, ones], axis=0).astype(jnp.bfloat16)   # (28, chunk)

        # Linear(27->64) + relu; bias folded into W1's 28th column. bf16 MXU, f32 acc.
        h = jnp.dot(w1_ref[...], emb, preferred_element_type=jnp.float32)  # (64, chunk)
        h = jnp.maximum(h, 0.0).astype(jnp.bfloat16)

        # Linear(64->3) + sigmoid.  sigmoid(x) == 0.5*(tanh(x/2)+1): exact identity,
        # tanh runs on the otherwise-idle EUP slot.
        z = jnp.dot(w2_ref[...], h, preferred_element_type=jnp.float32) + b2_ref[...]
        o_ref[:, cols] = 0.5 * jnp.tanh(0.5 * z) + 0.5                    # (3, chunk) lane-dense
        return carry

    # Short fixed trip count; fully unrolled for LLO visibility.  If a bundle dump
    # shows spill stores at large tm, sweep unroll in {1, 2, True}.
    jax.lax.fori_loop(0, num_chunks, chunk_body, 0, unroll=True)


def prepare_params(w1, b1, w2, b2):
    """One-time weight preprocessing (hoist out of the per-batch call).
    Inputs use (in_features, out_features) layout (== PyTorch weight.T):
    w1 (27, 64), b1 (1, 64), w2 (64, 3), b2 (1, 3).
    Returns channel-major kernel params: w1c (64, 28) bf16 (b1 folded into the last
    column), w2c (3, 64) bf16, b2c (3, 1) f32."""
    perm = jnp.asarray(EMBED_PERM, dtype=jnp.int32)
    w1p = jnp.take(jnp.asarray(w1, jnp.float32), perm, axis=0)            # (27, 64) grouped rows
    b1c = jnp.asarray(b1, jnp.float32).reshape(NET_WIDTH, 1)              # (64, 1)
    w1c = jnp.concatenate([w1p.T, b1c], axis=1).astype(jnp.bfloat16)      # (64, 28)
    w2c = jnp.asarray(w2, jnp.float32).T.astype(jnp.bfloat16)             # (3, 64)
    b2c = jnp.asarray(b2, jnp.float32).reshape(OUTPUT_DIM, 1)             # (3, 1)
    return w1c, w2c, b2c


def _round_up(x, m):
    return ((x + m - 1) // m) * m


def _color_encoder_cm(c_t, w1c, w2c, b2c, *, tm, chunk):
    """Core call.  c_t: (3, N) f32 channel-major; returns (3, N) f32."""
    n = c_t.shape[1]
    assert chunk % 128 == 0, "lane chunk must be a multiple of 128"
    # Keep tm a multiple of chunk, >= one chunk, and capped so the parallel grid
    # axis has >= 2 steps whenever possible (both v7x TensorCores stay busy).
    tm_eff = max(chunk, min(_round_up(tm, chunk), _round_up(pl.cdiv(n, 2), chunk)))
    grid = (pl.cdiv(n, tm_eff),)

    flops = 2 * n * (K_IN * NET_WIDTH + NET_WIDTH * OUTPUT_DIM)
    transcendentals = n * (2 * MULTIRES_COLOR * INPUT_DIM + OUTPUT_DIM)
    bytes_accessed = (4 * n * (INPUT_DIM + OUTPUT_DIM)
                      + 2 * (NET_WIDTH * K_IN + OUTPUT_DIM * NET_WIDTH)
                      + 4 * OUTPUT_DIM)

    return pl.pallas_call(
        functools.partial(color_encoder_kernel, chunk=chunk),
        out_shape=jax.ShapeDtypeStruct((OUTPUT_DIM, n), jnp.float32),
        grid_spec=pltpu.PrefetchScalarGridSpec(
            num_scalar_prefetch=0,
            grid=grid,
            in_specs=[
                pl.BlockSpec((INPUT_DIM, tm_eff), lambda i: (0, i)),       # c tile (3, tm)
                pl.BlockSpec((NET_WIDTH, K_IN), lambda i: (0, 0)),         # W1|b1  (64, 28) bf16
                pl.BlockSpec((OUTPUT_DIM, NET_WIDTH), lambda i: (0, 0)),   # W2     (3, 64) bf16
                pl.BlockSpec((OUTPUT_DIM, 1), lambda i: (0, 0)),           # b2     (3, 1)
            ],
            out_specs=pl.BlockSpec((OUTPUT_DIM, tm_eff), lambda i: (0, i)),  # out (3, tm)
        ),
        compiler_params=pltpu.CompilerParams(dimension_semantics=("parallel",)),
        cost_estimate=pl.CostEstimate(
            flops=flops, transcendentals=transcendentals, bytes_accessed=bytes_accessed),
    )(c_t, w1c, w2c, b2c)


@functools.partial(jax.jit, static_argnames=("tm", "chunk"))
def color_encoder_prepared(c, w1c, w2c, b2c, *, tm=2048, chunk=512):
    """Row-major convenience wrapper: c (N, 3) -> (N, 3).  For zero layout overhead,
    keep colors channel-major (3, N) and call _color_encoder_cm directly."""
    c_t = jnp.asarray(c, jnp.float32).T
    return _color_encoder_cm(c_t, w1c, w2c, b2c, tm=tm, chunk=chunk).T


def color_encoder(c, w1, b1, w2, b2, *, tm=2048, chunk=512):
    """Full convenience API matching the PyTorch module (weights given as W.T, i.e.
    (in_features, out_features)).  For inference loops call prepare_params once."""
    w1c, w2c, b2c = prepare_params(w1, b1, w2, b2)
    return color_encoder_prepared(c, w1c, w2c, b2c, tm=tm, chunk=chunk)


# ---------------------------- pure-JAX reference -----------------------------
def color_encoder_ref(c, w1, b1, w2, b2):
    """Mirrors the PyTorch forward (row-major, full f32)."""
    c = jnp.asarray(c, jnp.float32)
    feats = [c]
    for f in FREQS:
        feats.append(jnp.sin(c * f))
        feats.append(jnp.cos(c * f))
    h = jnp.concatenate(feats, axis=-1)
    h = jnp.maximum(h @ w1 + b1, 0.0)
    return jax.nn.sigmoid(h @ w2 + b2)


if __name__ == "__main__":
    key = jax.random.PRNGKey(0)
    k_c, k_w1, k_b1, k_w2, k_b2 = jax.random.split(key, 5)

    # Small deterministic demo; N deliberately NOT a multiple of the tile so the
    # masked partial tail block and a 2-step grid are exercised.
    N = 300
    c = jax.random.uniform(k_c, (N, INPUT_DIM), dtype=jnp.float32)  # colors in [0, 1)

    # Parameters in (in_features, out_features) layout (== PyTorch weight.T).
    w1 = jax.random.normal(k_w1, (EMBED_DIM, NET_WIDTH), dtype=jnp.float32) * 0.1
    b1 = jax.random.normal(k_b1, (1, NET_WIDTH), dtype=jnp.float32) * 0.01
    w2 = jax.random.normal(k_w2, (NET_WIDTH, OUTPUT_DIM), dtype=jnp.float32) * 0.1
    b2 = jax.random.normal(k_b2, (1, OUTPUT_DIM), dtype=jnp.float32) * 0.01

    # One-time weight prep (hoisted), then the kernel call (small demo tile;
    # production defaults are tm=2048, chunk=512 — sweep tm in 2K-8K).
    w1c, w2c, b2c = prepare_params(w1, b1, w2, b2)
    out = jax.block_until_ready(
        color_encoder_prepared(c, w1c, w2c, b2c, tm=256, chunk=256))
    ref = jax.block_until_ready(color_encoder_ref(c, w1, b1, w2, b2))

    assert out.shape == (N, OUTPUT_DIM)
    err = float(jnp.max(jnp.abs(out - ref)))
    # bf16 MXU operands (+ sin(x+pi/2) cos) vs f32 reference: expect ~1e-3 on [0,1] outputs.
    assert err < 2e-2, f"Pallas kernel mismatch vs reference (max abs err {err})"

    print("KERNEL_OK")
</pallas_src>

<mosaic_0001>
module attributes {stable_mosaic.version = 11 : i64} {
  func.func @color_encoder_kernel(%arg0: i32, %arg1: memref<3x256xf32, #tpu.memory_space<vmem>>, %arg2: memref<64x28xbf16, #tpu.memory_space<vmem>>, %arg3: memref<3x64xbf16, #tpu.memory_space<vmem>>, %arg4: memref<3x1xf32, #tpu.memory_space<vmem>>, %arg5: memref<3x256xf32, #tpu.memory_space<vmem>>) attributes {dimension_semantics = [#tpu.dimension_semantics<parallel>], iteration_bounds = array<i64: 2>, scalar_prefetch = 0 : i64, scratch_operands = 0 : i64, tpu.core_type = #tpu.core_type<tc>, window_params = [{transform_indices = @transform_0, window_bounds = array<i64: 3, 256>}, {pipeline_mode = #tpu.pipeline_mode<synchronous>, transform_indices = @transform_1, window_bounds = array<i64: 64, 28>}, {pipeline_mode = #tpu.pipeline_mode<synchronous>, transform_indices = @transform_2, window_bounds = array<i64: 3, 64>}, {pipeline_mode = #tpu.pipeline_mode<synchronous>, transform_indices = @transform_3, window_bounds = array<i64: 3, 1>}, {transform_indices = @transform_4, window_bounds = array<i64: 3, 256>}]} {
    %c0_i32 = arith.constant 0 : i32
    %c256_i32 = arith.constant 256 : i32
    %0 = arith.muli %c0_i32, %c256_i32 : i32
    %1 = tpu.assume_multiple %0, 256 : i32
    %c0 = arith.constant 0 : index
    %2 = arith.index_cast %1 : i32 to index
    %3 = vector.load %arg1[%c0, %2] : memref<3x256xf32, #tpu.memory_space<vmem>>, vector<3x256xf32>
    %cst = arith.constant 1.000000e+00 : f32
    %4 = vector.broadcast %cst : f32 to vector<3x256xf32>
    %5 = arith.mulf %3, %4 : vector<3x256xf32>
    %cst_0 = arith.constant 2.000000e+00 : f32
    %6 = vector.broadcast %cst_0 : f32 to vector<3x256xf32>
    %7 = arith.mulf %3, %6 : vector<3x256xf32>
    %cst_1 = arith.constant 4.000000e+00 : f32
    %8 = vector.broadcast %cst_1 : f32 to vector<3x256xf32>
    %9 = arith.mulf %3, %8 : vector<3x256xf32>
    %cst_2 = arith.constant 8.000000e+00 : f32
    %10 = vector.broadcast %cst_2 : f32 to vector<3x256xf32>
    %11 = arith.mulf %3, %10 : vector<3x256xf32>
    %12 = tpu.concatenate %5, %7, %9, %11 in 0 : vector<3x256xf32>, vector<3x256xf32>, vector<3x256xf32>, vector<3x256xf32> -> vector<12x256xf32>
    %cst_3 = arith.constant 1.57079637 : f32
    %13 = vector.broadcast %cst_3 : f32 to vector<12x256xf32>
    %14 = arith.addf %12, %13 : vector<12x256xf32>
    %15 = tpu.concatenate %12, %14 in 0 : vector<12x256xf32>, vector<12x256xf32> -> vector<24x256xf32>
    %16 = math.sin %15 : vector<24x256xf32>
    %cst_4 = arith.constant 1.000000e+00 : f32
    %17 = vector.broadcast %cst_4 : f32 to vector<1x256xf32>
    %18 = tpu.concatenate %3, %16, %17 in 0 : vector<3x256xf32>, vector<24x256xf32>, vector<1x256xf32> -> vector<28x256xf32>
    %19 = arith.truncf %18 : vector<28x256xf32> to vector<28x256xbf16>
    %c0_5 = arith.constant 0 : index
    %c0_6 = arith.constant 0 : index
    %20 = vector.load %arg2[%c0_5, %c0_6] : memref<64x28xbf16, #tpu.memory_space<vmem>>, vector<64x28xbf16>
    %cst_7 = arith.constant dense<0.000000e+00> : vector<64x256xf32>
    %21 = tpu.matmul %20, %19, %cst_7 {dimension_numbers = #tpu.dot_dimension_numbers<[1], [0], [0], [1], [0, 0, 1, 1], [], []>} : vector<64x28xbf16>, vector<28x256xbf16>, vector<64x256xf32> -> vector<64x256xf32>
    %cst_8 = arith.constant 0.000000e+00 : f32
    %22 = vector.broadcast %cst_8 : f32 to vector<64x256xf32>
    %23 = arith.maximumf %21, %22 : vector<64x256xf32>
    %24 = arith.truncf %23 : vector<64x256xf32> to vector<64x256xbf16>
    %c0_9 = arith.constant 0 : index
    %c0_10 = arith.constant 0 : index
    %25 = vector.load %arg3[%c0_9, %c0_10] : memref<3x64xbf16, #tpu.memory_space<vmem>>, vector<3x64xbf16>
    %cst_11 = arith.constant dense<0.000000e+00> : vector<3x256xf32>
    %26 = tpu.matmul %25, %24, %cst_11 {dimension_numbers = #tpu.dot_dimension_numbers<[1], [0], [0], [1], [0, 0, 1, 1], [], []>} : vector<3x64xbf16>, vector<64x256xbf16>, vector<3x256xf32> -> vector<3x256xf32>
    %c0_12 = arith.constant 0 : index
    %c0_13 = arith.constant 0 : index
    %27 = vector.load %arg4[%c0_12, %c0_13] : memref<3x1xf32, #tpu.memory_space<vmem>>, vector<3x1xf32>
    %28 = vector.broadcast %27 : vector<3x1xf32> to vector<3x256xf32>
    %29 = arith.addf %26, %28 : vector<3x256xf32>
    %cst_14 = arith.constant 5.000000e-01 : f32
    %30 = vector.broadcast %cst_14 : f32 to vector<3x256xf32>
    %31 = arith.mulf %30, %29 : vector<3x256xf32>
    %32 = math.tanh %31 : vector<3x256xf32>
    %cst_15 = arith.constant 5.000000e-01 : f32
    %33 = vector.broadcast %cst_15 : f32 to vector<3x256xf32>
    %34 = arith.mulf %33, %32 : vector<3x256xf32>
    %cst_16 = arith.constant 5.000000e-01 : f32
    %35 = vector.broadcast %cst_16 : f32 to vector<3x256xf32>
    %36 = arith.addf %34, %35 : vector<3x256xf32>
    %c0_17 = arith.constant 0 : index
    %37 = arith.index_cast %1 : i32 to index
    %38 = vector.load %arg5[%c0_17, %37] : memref<3x256xf32, #tpu.memory_space<vmem>>, vector<3x256xf32>
    tpu.vector_store %arg5[%c0_17, %37], %36 {strides = array<i32>} : memref<3x256xf32, #tpu.memory_space<vmem>>, vector<3x256xf32>,
    %c1_i32 = arith.constant 1 : i32
    return
  }
  func.func @transform_0(%arg0: i32) -> (i32, i32) {
    %c0_i32 = arith.constant 0 : i32
    %c0_i32_0 = arith.constant 0 : i32
    return %c0_i32, %arg0 : i32, i32
  }
  func.func @transform_1(%arg0: i32) -> (i32, i32) {
    %c0_i32 = arith.constant 0 : i32
    %c0_i32_0 = arith.constant 0 : i32
    %c0_i32_1 = arith.constant 0 : i32
    return %c0_i32, %c0_i32_0 : i32, i32
  }
  func.func @transform_2(%arg0: i32) -> (i32, i32) {
    %c0_i32 = arith.constant 0 : i32
    %c0_i32_0 = arith.constant 0 : i32
    %c0_i32_1 = arith.constant 0 : i32
    return %c0_i32, %c0_i32_0 : i32, i32
  }
  func.func @transform_3(%arg0: i32) -> (i32, i32) {
    %c0_i32 = arith.constant 0 : i32
    %c0_i32_0 = arith.constant 0 : i32
    %c0_i32_1 = arith.constant 0 : i32
    return %c0_i32, %c0_i32_0 : i32, i32
  }
  func.func @transform_4(%arg0: i32) -> (i32, i32) {
    %c0_i32 = arith.constant 0 : i32
    %c0_i32_0 = arith.constant 0 : i32
    return %c0_i32, %arg0 : i32, i32
  }
}

</mosaic_0001>

<bundles_post_ra>
// kernel: color_encoder_prepared.1
= control target key start
LH: loop header
LB: loop body
LE: loop exit
PB: predicated region body
PF: predicated region fallthrough
CT: control target
= control target key end

     0   :  { %9 = vsyncpa [#allocation3], 0  ;;  %s2166_s0 = inlined_call_operand.vmem [shape: f32[3,300], index: 0, kind: input, shape index: {}]   ;;  %s2167_s1 = inlined_call_operand.vmem [shape: bf16[64,28], index: 1, kind: input, shape index: {}]   ;;  %s2168_s2 = inlined_call_operand.vmem [shape: bf16[3,64], index: 2, kind: input, shape index: {}]   ;;  %s2169_s3 = inlined_call_operand.vmem [shape: f32[3,1], index: 3, kind: input, shape index: {}]   ;;  %s2170_s4 = inlined_call_operand.hbm [shape: f32[3,300], index: 4, kind: output, shape index: {}]  }
   0x1   :  { %11 = vsyncpa [#allocation3 + $0x1], 0  ;;  %s1476_s15 = smov 0   ;;  %s1478_s16 = smov 0  }
   0x2   :  { %s1480_s17 = smov 0   ;;  %s1482_s18 = smov 0  }
   0x3 LB: > { %s1497_s19 = sadd.s32 4294967295, %s1441_s18   ;;  %s1224_s20 = sadd.s32 4294967294, %s1441_s18   ;;  %s1441_s18 = sphi %s1482_s18, %s2184_s18   ;;  %s1437_s17 = sphi %s1480_s17, %s2183_s17   ;;  %s1433_s16 = sphi %s1478_s16, %s2182_s16   ;;  %s1429_s15 = sphi %s1476_s15, %s2181_s15  }
   0x4   : > { %s1501_s21 = sadd.s32 1, %s1441_s18   ;;  %s113_s22 = sadd.s32 1, %s1437_s17 }
   0x5   : > { %s110_s23 = ssub.s32 %s1441_s18, %s1501_s21  ;;  %p123_p0 = scmp.ne.s32.totalorder %s1437_s17, %s1433_s16 }
   0x6   : > { %p111_p1 = scmp.eq.s32.totalorder %s110_s23, 0  ;;  %p124_p2 = scmp.eq.s32.totalorder %s1497_s19, 1 }
   0x7   : > { %p129_p3 = scmp.ne.s32.totalorder %s1433_s16, %s1429_s15  ;;  %p130_p4 = scmp.eq.s32.totalorder %s1224_s20, 1 }
   0x8   : > { %s1512_s24 = scalar_select %p111_p1, %s1437_s17, %s113_s22  }
   0x9   : > { %p1514_p5 = por %p124_p2, %p123_p0  ;;  %p1518_p6 = por %p130_p4, %p129_p3 }
   0xa   : > { %p1227_p7 = scmp.ge.s32.totalorder %s1441_s18, 1  ;;  %p174_p8 = scmp.lt.s32.totalorder %s1441_s18, 3 }
   0xc   : > { %p175_p9 = pnand %p1227_p7, %p174_p8 }
   0xd   : > { %s1525_s27 = sshll.u32 (!%p175_p9), %s1497_s19, 1  ;;  %vm249_vm0 = vcmask (!%p175_p9), 1042432   ;;  %vm252_vm1 = vcmask (!%p175_p9), 1045504   ;;  %vm255_vm2 = vcmask (!%p175_p9), 1040384   ;;  %vm266_vm3 = vcmask (!%p175_p9), 1043456  }
   0xe   : > { %178 = sbr.rel (%p175_p9) target bundleno = 740 (0x2e4), region = 36  ;;  %p209_p10 = scmp.lt.s32.totalorder (!%p175_p9), %s1525_s27, 2  ;;  %v1443_v48 = vmov (!%p175_p9), 683565275   ;;  %v1444_v50 = vmov (!%p175_p9), 2475754826  }
   0xf   : > { %v1445_v52 = vmov (!%p175_p9), 2131351028   ;;  %v1446_v54 = vmov (!%p175_p9), 2102212464   ;;  %v1447_v56 = vmov (!%p175_p9), 920167782  }
  0x15   : > { %s210_s28 = scalar_select %p209_p10, %s1525_s27, 2 }
  0x16   : > { %s1153_s7 = ssub.s32 (%p1514_p5), 3, %s1525_s27 }
  0x17   : > { %s1230_s29 = sshll.u32 %s210_s28, 2  ;;  %p1154_p11 = scmp.lt.s32.totalorder (%p1514_p5), %s1153_s7, 2 }
  0x18   : > { %s1532_s6 = scalar_lea.vmem %s2166_s0, %s1230_s29  ;;  %s201_s29 = sand.u32 1, %s1433_s16  }
  0x19   : > { %v224_v0 = vld [vmem:[%s1532_s6] sm:$0x77]  ;;  %s1228_s30 = sshll.u32 %s201_s29, 3 }
  0x1a   : > { %v225_v1 = vmul.f32 2.0, %v224_v0  ;;  %v226_v2 = vmul.f32 4.0, %v224_v0  ;;  %v227_v3 = vmul.f32 8.0, %v224_v0  ;;  %v1535_v4 = vcombine.high %v224_v0, %v224_v0  ;;  %s203_s5 = scalar_lea.vmem [#allocation2], %s1228_s30 }
  0x1c   : > { %v232_v5 = vcombine.high %v225_v1, %v225_v1  ;;  %v238_v6 = vcombine.high %v226_v2, %v226_v2  ;;  %v244_v7 = vcombine.high %v227_v3, %v227_v3  ;;  %v233_v8 = vrot.slane %v225_v1, 5 }
  0x1d   : > { %v239_v13 = vrot.slane %v226_v2, 2  ;;  %v245_v30 = vrot.slane %v227_v3, 7 }
  0x1e   : > { %v234_v9 = vrot.slane %v232_v5, 5  ;;  %v240_v10 = vrot.slane %v238_v6, 2  ;;  %v246_v11 = vrot.slane %v244_v7, 7  ;;  %v250_v15 = vsel %vm249_vm0, %v224_v0, %v233_v8 }
  0x1f   : > { %v1553_v22 = vsel %vm252_vm1, %v250_v15, %v239_v13  ;;  %v1572_v41 = vsel %vm255_vm2, %v239_v13, %v245_v30  ;;  %v1448_v0 = vmov 1326507024  }
  0x20   : > { %v251_v12 = vsel %vm249_vm0, %v1535_v4, %v234_v9  ;;  %v1549_v19 = vsel %vm255_vm2, %v240_v10, %v246_v11  ;;  %v282_v24 = vand.u32 2139095040, %v1553_v22  ;;  %v1569_v35 = vadd.f32 1.5707964, %v1553_v22 }
  0x21   : > { %v1540_v14 = vsel %vm252_vm1, %v251_v12, %v240_v10  ;;  %v279_v42 = vand.u32 2147483647, %v1553_v22 }
  0x22   : > { %v1544_v16 = vadd.f32 1.5707964, %v1540_v14  ;;  %v383_v17 = vand.u32 2147483647, %v1540_v14  ;;  %v386_v18 = vand.u32 2139095040, %v1540_v14  ;;  %v283_v31 = vshrl.u32 %v282_v24, 23 }
  0x23   : > { %v267_v46 = vrot.slane %v1569_v35, 4 }
  0x24   : > { %v268_v20 = vrot.slane %v1544_v16, 4  ;;  %v387_v21 = vshrl.u32 %v386_v18, 23  ;;  %v390_v23 = vand.u32 8388607, %v383_v17  ;;  %v1231_v38 = vadd.s32 4294967169, %v283_v31 }
  0x26   : > { %v1562_v25 = vsel %vm266_vm3, %v1549_v19, %v268_v20  ;;  %v1235_v26 = vadd.s32 4294967169, %v387_v21  ;;  %v391_v32 = vor.u32 8388608, %v390_v23  ;;  %v1583_v58 = vadd.s32 1, %v1231_v38 }
  0x27   : > { %v591_v27 = vand.u32 2147483647, %v1562_v25  ;;  %v594_v28 = vand.u32 2139095040, %v1562_v25 }
  0x28   : > { %v393_v29 = vadd.s32 1, %v1235_v26  ;;  %v1575_v43 = vshll.u32 %v391_v32, 8  ;;  %vm290_vm10 = vcmp.gt.s32.totalorder %v1583_v58, 0 }
  0x29   : > { %v595_v33 = vshrl.u32 %v594_v28, 23  ;;  %v598_v34 = vand.u32 8388607, %v591_v27 }
  0x2a   : > { %vm394_vm4 = vcmp.gt.s32.totalorder %v393_v29, 0 }
  0x2b   : > { %v395_v36 = vsel %vm394_vm4, %v393_v29, 0  ;;  %v1243_v37 = vadd.s32 4294967169, %v595_v33  ;;  %v599_v44 = vor.u32 8388608, %v598_v34  ;;  %vm385_vm4 = vcmp.lt.s32.totalorder %v1540_v14, 0 }
  0x2c   : > { %v396_v39 = vshrl.u32 %v395_v36, 5  ;;  %v397_v40 = vand.u32 31, %v395_v36 }
  0x2d   : > { %v601_v45 = vadd.s32 1, %v1243_v37  ;;  %v1594_v21 = vshll.u32 %v599_v44, 8 }
  0x2e   : > { %v398_v47 = vsub.s32 32, %v397_v40  ;;  %v400_v49 = vshll.u32 %v1443_v48, %v397_v40  ;;  %v403_v51 = vshll.u32 %v1444_v50, %v397_v40  ;;  %v406_v53 = vshll.u32 %v1445_v52, %v397_v40 }
  0x2f   : > { %v409_v55 = vshll.u32 %v1446_v54, %v397_v40  ;;  %v412_v57 = vshll.u32 %v1447_v56, %v397_v40  ;;  %vm415_vm5 = vcmp.lt.s32.totalorder %v396_v39, 1  ;;  %vm416_vm6 = vcmp.lt.s32.totalorder %v396_v39, 2 }
  0x30   : > { %v399_v59 = vshrl.u32 %v1443_v48, %v398_v47  ;;  %v401_v60 = vshrl.u32 %v1444_v50, %v398_v47  ;;  %v404_v61 = vshrl.u32 %v1445_v52, %v398_v47  ;;  %v407_v62 = vshrl.u32 %v1446_v54, %v398_v47 }
  0x31   : > { %v410_v63 = vshrl.u32 %v1447_v56, %v398_v47  ;;  %v413_v1 = vshrl.u32 %v1448_v0, %v398_v47  ;;  %vm418_vm7 = vcmp.lt.s32.totalorder %v396_v39, 4  ;;  %vm602_vm8 = vcmp.gt.s32.totalorder %v601_v45, 0 }
  0x32   : > { %v402_v2 = vor.u32 %v401_v60, %v400_v49  ;;  %v405_v3 = vor.u32 %v404_v61, %v403_v51  ;;  %v408_v5 = vor.u32 %v407_v62, %v406_v53  ;;  %vm417_vm9 = vcmp.lt.s32.totalorder %v396_v39, 3 }
  0x33   : > { %v411_v6 = vor.u32 %v410_v63, %v409_v55  ;;  %v414_v7 = vor.u32 %v413_v1, %v412_v57  ;;  %v603_v8 = vsel %vm602_vm8, %v601_v45, 0 }
  0x34   : > { %v419_v9 = vsel %vm415_vm5, %v399_v59, %v402_v2  ;;  %v420_v10 = vsel %vm418_vm7, %v408_v5, 2102212464  ;;  %v423_v11 = vsel %vm415_vm5, %v402_v2, %v405_v3  ;;  %v427_v12 = vsel %vm415_vm5, %v405_v3, %v408_v5 }
  0x35   : > { %v421_v13 = vsel %vm417_vm9, %v405_v3, %v420_v10  ;;  %v424_v15 = vsel %vm418_vm7, %v411_v6, 920167782  ;;  %v428_v18 = vsel %vm418_vm7, %v414_v7, 1326507024  ;;  %v604_v26 = vshrl.u32 %v603_v8, 5 }
  0x36   : > { %v425_v23 = vsel %vm417_vm9, %v408_v5, %v424_v15  ;;  %v429_v24 = vsel %vm417_vm9, %v411_v6, %v428_v18  ;;  %v605_v28 = vand.u32 31, %v603_v8  ;;  %v422_v29 = vsel %vm416_vm6, %v419_v9, %v421_v13 }
  0x37   : > { %v426_v30 = vsel %vm416_vm6, %v423_v11, %v425_v23  ;;  %v430_v31 = vsel %vm416_vm6, %v427_v12, %v429_v24  ;;  %v438_v39 = vmul.u32 %v1575_v43, %v422_v29  ;;  %vm623_vm11 = vcmp.lt.s32.totalorder %v604_v26, 1 }
  0x38   : > { %v1601_v32 = vmul.u32.u64.low %v1575_v43, %v430_v31  ;;  %v1602_v33 = vmul.u32.u64.high %v1575_v43, %v430_v31, %v1601_v32  ;;  %v1605_v34 = vmul.u32.u64.low %v1575_v43, %v426_v30  ;;  %v1606_v36 = vmul.u32.u64.high %v1575_v43, %v426_v30, %v1605_v34 }
  0x39   : > { %v606_v37 = vsub.s32 32, %v605_v28  ;;  %v608_v38 = vshll.u32 %v1443_v48, %v605_v28  ;;  %v611_v40 = vshll.u32 %v1444_v50, %v605_v28  ;;  %v614_v44 = vshll.u32 %v1445_v52, %v605_v28 }
  0x3a   : > { %v617_v45 = vshll.u32 %v1446_v54, %v605_v28  ;;  %v620_v47 = vshll.u32 %v1447_v56, %v605_v28  ;;  %vm440_vm12 = vc.u32 %v1602_v33, %v1605_v34  ;;  %v441_v57 = vadd.s32 1, %v1606_v36 }
  0x3b   : > { %v607_v49 = vshrl.u32 %v1443_v48, %v606_v37  ;;  %v609_v51 = vshrl.u32 %v1444_v50, %v606_v37  ;;  %v612_v53 = vshrl.u32 %v1445_v52, %v606_v37  ;;  %v615_v55 = vshrl.u32 %v1446_v54, %v606_v37 }
  0x3c   : > { %v618_v43 = vshrl.u32 %v1447_v56, %v606_v37  ;;  %vm624_vm13 = vcmp.lt.s32.totalorder %v604_v26, 2  ;;  %v621_v62 = vshrl.u32 %v1448_v0, %v606_v37  ;;  %v442_v63 = vsel %vm440_vm12, %v441_v57, %v1606_v36 }
  0x3d   : > { %v610_v59 = vor.u32 %v609_v51, %v608_v38  ;;  %v613_v60 = vor.u32 %v612_v53, %v611_v40  ;;  %v616_v61 = vor.u32 %v615_v55, %v614_v44  ;;  %vm625_vm14 = vcmp.lt.s32.totalorder %v604_v26, 3 }
  0x3e   : > { %v619_v1 = vor.u32 %v618_v43, %v617_v45  ;;  %vm626_vm15 = vcmp.lt.s32.totalorder %v604_v26, 4  ;;  %v443_v2 = vadd.s32 %v442_v63, %v438_v39  ;;  %v622_v3 = vor.u32 %v621_v62, %v620_v47 }
  0x3f   : > { %v627_v5 = vsel %vm623_vm11, %v607_v49, %v610_v59  ;;  %v628_v6 = vsel %vm626_vm15, %v616_v61, 2102212464  ;;  %v631_v8 = vsel %vm623_vm11, %v610_v59, %v613_v60  ;;  %v635_v10 = vsel %vm623_vm11, %v613_v60, %v616_v61 }
  0x40   : > { %v629_v7 = vsel %vm625_vm14, %v613_v60, %v628_v6  ;;  %v632_v9 = vsel %vm626_vm15, %v619_v1, 920167782  ;;  %v444_v11 = vadd.s32 536870912, %v443_v2  ;;  %v636_v13 = vsel %vm626_vm15, %v622_v3, 1326507024 }
  0x41   : > { %v633_v12 = vsel %vm625_vm14, %v616_v61, %v632_v9  ;;  %v291_v15 = vsel %vm290_vm10, %v1583_v58, 0  ;;  %v630_v18 = vsel %vm624_vm13, %v627_v5, %v629_v7  ;;  %v637_v24 = vsel %vm625_vm14, %v619_v1, %v636_v13 }
  0x42   : > { %v634_v23 = vsel %vm624_vm13, %v631_v8, %v633_v12  ;;  %v286_v28 = vand.u32 8388607, %v279_v42  ;;  %v1638_v29 = vshrl.u32 %v444_v11, 30  ;;  %v638_v30 = vsel %vm624_vm13, %v635_v10, %v637_v24 }
  0x43   : > { %v1642_v31 = vmul.u32.u64.low %v1594_v21, %v634_v23  ;;  %v1643_v32 = vmul.u32.u64.high %v1594_v21, %v634_v23, %v1642_v31  ;;  %v1647_v58 = vmul.u32.u64.low %v1594_v21, %v638_v30  ;;  %v1648_v36 = vmul.u32.u64.high %v1594_v21, %v638_v30, %v1647_v58 }
  0x44   : > { %v1654_v37 = vsel %vm266_vm3, %v1572_v41, %v267_v46  ;;  %v293_v38 = vand.u32 31, %v291_v15  ;;  %v446_v40 = vshll.u32 %v1638_v29, 30  ;;  %v1658_v26 = vadd.f32 1.5707964, %v1549_v19 }
  0x45   : > { %v646_v44 = vmul.u32 %v1594_v21, %v630_v18  ;;  %v287_v39 = vor.u32 8388608, %v286_v28  ;;  %v649_v49 = vadd.s32 1, %v1643_v32  ;;  %v1664_v51 = vshrl.u32 %v291_v15, 5 }
  0x46   : > { %v294_v45 = vsub.s32 32, %v293_v38  ;;  %v1661_v47 = vsub.s32 %v443_v2, %v446_v40  ;;  %v490_v53 = vand.u32 2139095040, %v1654_v37  ;;  %vm648_vm2 = vc.u32 %v1648_v36, %v1642_v31 }
  0x47   : > { %v296_v55 = vshll.u32 %v1443_v48, %v293_v38  ;;  %v299_v19 = vshll.u32 %v1444_v50, %v293_v38  ;;  %v305_v57 = vshll.u32 %v1446_v54, %v293_v38  ;;  %v650_v43 = vsel %vm648_vm2, %v649_v49, %v1643_v32 }
  0x48   : > { %v449_v21 = vsub.s32 0, %v1661_v47  ;;  %v297_v59 = vshrl.u32 %v1444_v50, %v294_v45  ;;  %v302_v60 = vshll.u32 %v1445_v52, %v293_v38  ;;  %v651_v61 = vadd.s32 %v650_v43, %v646_v44 }
  0x49   : > { %v300_v62 = vshrl.u32 %v1445_v52, %v294_v45  ;;  %v303_v63 = vshrl.u32 %v1446_v54, %v294_v45  ;;  %v306_v1 = vshrl.u32 %v1447_v56, %v294_v45  ;;  %v271_v2 = vrot.slane %v1658_v26, 4 }
  0x4a   : > { %v1236_v3 = vmin.u32 %v449_v21, %v1661_v47  ;;  %v1683_v5 = vadd.f32 1.5707964, %v1572_v41  ;;  %v652_v6 = vadd.s32 536870912, %v651_v61  ;;  %v308_v8 = vshll.u32 %v1447_v56, %v293_v38 }
  0x4b   : > { %v307_v7 = vor.u32 %v306_v1, %v305_v57  ;;  %v1686_v9 = vshll.u32 %v287_v39, 8  ;;  %v298_v11 = vor.u32 %v297_v59, %v296_v55  ;;  %v301_v12 = vor.u32 %v300_v62, %v299_v19 }
  0x4c   : > { %v451_v10 = vclz %v1236_v3  ;;  %v491_v13 = vshrl.u32 %v490_v53, 23  ;;  %v1688_v15 = vshrl.u32 %v652_v6, 30  ;;  %v304_v18 = vor.u32 %v303_v63, %v302_v60 }
  0x4d   : > { %v309_v23 = vshrl.u32 %v1448_v0, %v294_v45  ;;  %vm314_vm5 = vcmp.lt.s32.totalorder %v1664_v51, 4  ;;  %vm1694_vm6 = vcmp.le.f32.partialorder %v383_v17, 0.7853982  ;;  %vm311_vm7 = vcmp.lt.s32.totalorder %v1664_v51, 1 }
  0x4e   : > { %v1237_v24 = vadd.s32 4294967294, %v451_v10  ;;  %vm313_vm8 = vcmp.lt.s32.totalorder %v1664_v51, 3  ;;  %v320_v28 = vsel %vm314_vm5, %v307_v7, 920167782  ;;  %v469_v30 = vsub.s32 4, %v1638_v29 }
  0x4f   : > { %v654_v32 = vshll.u32 %v1688_v15, 30  ;;  %v295_v58 = vshrl.u32 %v1443_v48, %v294_v45  ;;  %v310_v38 = vor.u32 %v309_v23, %v308_v8  ;;  %v439_v17 = vadd.s32 %v1605_v34, %v1602_v33 }
  0x50   : > { %vm1238_vm9 = vcmp.lt.s32.totalorder %v1237_v24, 0  ;;  %vm312_vm10 = vcmp.lt.s32.totalorder %v1664_v51, 2  ;;  %v316_v40 = vsel %vm314_vm5, %v304_v18, 2102212464  ;;  %v319_v49 = vsel %vm311_vm7, %v298_v11, %v301_v12 }
  0x51   : > { %v454_v44 = vsel %vm1238_vm9, 0, %v1237_v24  ;;  %v1710_v39 = vsub.s32 %v651_v61, %v654_v32  ;;  %v321_v53 = vsel %vm313_vm8, %v304_v18, %v320_v28  ;;  %v323_v33 = vsel %vm311_vm7, %v301_v12, %v304_v18 }
  0x52   : > { %v455_v45 = vsub.s32 32, %v454_v44  ;;  %v456_v55 = vshll.u32 %v1661_v47, %v454_v44  ;;  %v459_v19 = vsub.s32 4294967266, %v454_v44  ;;  %v470_v34 = vsel %vm385_vm4, %v469_v30, %v1638_v29 }
  0x53   : > { %v657_v57 = vsub.s32 0, %v1710_v39  ;;  %v315_v21 = vsel %vm311_vm7, %v295_v58, %v298_v11  ;;  %v324_v43 = vsel %vm314_vm5, %v310_v38, 1326507024  ;;  %v317_v47 = vsel %vm313_vm8, %v301_v12, %v316_v40 }
  0x54   : > { %v457_v59 = vshrl.u32 %v439_v17, %v455_v45  ;;  %v460_v60 = vadd.s32 127, %v459_v19  ;;  %v325_v61 = vsel %vm313_vm8, %v307_v7, %v324_v43  ;;  %v322_v29 = vsel %vm312_vm10, %v319_v49, %v321_v53 }
  0x55   : > { %v1244_v62 = vmin.u32 %v657_v57, %v1710_v39  ;;  %v326_v63 = vsel %vm312_vm10, %v323_v33, %v325_v61  ;;  %v1239_v1 = vadd.s32 4294967169, %v491_v13  ;;  %v472_v11 = vsel %vm1694_vm6, 0, %v470_v34 }
  0x56   : > { %v458_v3 = vor.u32 %v457_v59, %v456_v55  ;;  %v461_v6 = vshll.u32 %v460_v60, 23  ;;  %v1737_v8 = vmul.u32.u64.low %v1686_v9, %v326_v63  ;;  %v1738_v10 = vmul.u32.u64.high %v1686_v9, %v326_v63, %v1737_v8 }
  0x57   : > { %v659_v12 = vclz %v1244_v62  ;;  %v269_v7 = vrot.slane %v1683_v5, 4  ;;  %v318_v18 = vsel %vm312_vm10, %v315_v21, %v317_v47  ;;  %v647_v30 = vadd.s32 %v1642_v31, %v1648_v36 }
  0x58   : > { %v462_v23 = vor.u32 4788187, %v461_v6  ;;  %v465_v24 = vcvt.s32.f32 %v458_v3  ;;  %v1746_v28 = vmul.u32.u64.low %v1686_v9, %v322_v29  ;;  %v1747_v13 = vmul.u32.u64.high %v1686_v9, %v322_v29, %v1746_v28 }
  0x59   : > { %v1245_v32 = vadd.s32 4294967294, %v659_v12  ;;  %v487_v58 = vand.u32 2147483647, %v1654_v37  ;;  %v497_v38 = vadd.s32 1, %v1239_v1  ;;  %v476_v40 = vadd.s32 3, %v472_v11 }
  0x5a   : > { %v463_v17 = vand.u32 2147483647, %v462_v23  ;;  %v677_v44 = vsub.s32 4, %v1688_v15  ;;  %v1759_v51 = vsel %vm266_vm3, %v268_v20, %v271_v2  ;;  %v334_v49 = vmul.u32 %v1686_v9, %v318_v18 }
  0x5b   : > { %vm1246_vm11 = vcmp.lt.s32.totalorder %v1245_v32, 0  ;;  %vm336_vm12 = vc.u32 %v1738_v10, %v1746_v28  ;;  %vm498_vm13 = vcmp.gt.s32.totalorder %v497_v38, 0  ;;  %v337_v53 = vadd.s32 1, %v1747_v13 }
  0x5c   : > { %v466_v31 = vmul.f32 %v465_v24, %v463_v17  ;;  %v662_v36 = vsel %vm1246_vm11, 0, %v1245_v32  ;;  %v499_v45 = vsel %vm498_vm13, %v497_v38, 0  ;;  %vm593_vm14 = vcmp.lt.s32.totalorder %v1562_v25, 0 }
  0x5d   : > { %v663_v26 = vsub.s32 32, %v662_v36  ;;  %v664_v16 = vshll.u32 %v1710_v39, %v662_v36  ;;  %v667_v55 = vsub.s32 4294967266, %v662_v36  ;;  %vm1769_vm15 = vcmp.le.f32.partialorder %v591_v27, 0.7853982 }
  0x5e   : > { %v467_v20 = vxor.u32 2147483648, %v466_v31  ;;  %v338_v9 = vsel %vm336_vm12, %v337_v53, %v1747_v13  ;;  %v501_v19 = vand.u32 31, %v499_v45  ;;  %v494_v21 = vand.u32 8388607, %v487_v58 }
  0x5f   : > { %v665_v33 = vshrl.u32 %v647_v30, %v663_v26  ;;  %v668_v34 = vadd.s32 127, %v667_v55  ;;  %v339_v57 = vadd.s32 %v338_v9, %v334_v49  ;;  %v1778_v43 = vand.u32 3, %v476_v40 }
  0x60   : > { %v468_v39 = vsel %vm385_vm4, %v467_v20, %v466_v31  ;;  %v678_v27 = vsel %vm593_vm14, %v677_v44, %v1688_v15  ;;  %v502_v59 = vsub.s32 32, %v501_v19  ;;  %v1786_v29 = vshrl.u32 %v499_v45, 5 }
  0x61   : > { %v471_v60 = vsel %vm1694_vm6, %v1540_v14, %v468_v39  ;;  %v666_v47 = vor.u32 %v665_v33, %v664_v16  ;;  %v669_v61 = vshll.u32 %v668_v34, 23  ;;  %v340_v62 = vadd.s32 536870912, %v339_v57 }
  0x62   : > { %1350 = vcosq.f32 %v471_v60  ;;  %v504_v63 = vshll.u32 %v1443_v48, %v501_v19  ;;  %v507_v1 = vshll.u32 %v1444_v50, %v501_v19  ;;  %v505_v15 = vshrl.u32 %v1444_v50, %v502_v59 }
  0x63   : > { %1352 = vsinq.f32 %v471_v60  ;;  %v670_v3 = vor.u32 4788187, %v669_v61  ;;  %v673_v6 = vcvt.s32.f32 %v666_v47  ;;  %v1790_v8 = vshrl.u32 %v340_v62, 30 }
  0x64   : > { %v508_v41 = vshrl.u32 %v1445_v52, %v502_v59  ;;  %v510_v11 = vshll.u32 %v1445_v52, %v501_v19  ;;  %v511_v12 = vshrl.u32 %v1446_v54, %v502_v59  ;;  %v680_v23 = vsel %vm1769_vm15, 0, %v678_v27 }
  0x65   : > { %v671_v18 = vand.u32 2147483647, %v670_v3  ;;  %v342_v24 = vshll.u32 %v1790_v8, 30  ;;  %v513_v13 = vshll.u32 %v1446_v54, %v501_v19  ;;  %vm479_vm2 = vcmp.eq.s32.totalorder %v1778_v43, 0 }
  0x66   : > { %vm482_vm4 = vcmp.eq.s32.totalorder %v1778_v43, 2  ;;  %v495_v30 = vor.u32 8388608, %v494_v21  ;;  %v503_v32 = vshrl.u32 %v1443_v48, %v502_v59  ;;  %v514_v38 = vshrl.u32 %v1447_v56, %v502_v59 }
  0x67   : > { %vm519_vm5 = vcmp.lt.s32.totalorder %v1786_v29, 1  ;;  %v674_v17 = vmul.f32 %v673_v6, %v671_v18  ;;  %v1805_v40 = vsub.s32 %v339_v57, %v342_v24  ;;  %v516_v44 = vshll.u32 %v1447_v56, %v501_v19 }
  0x68   : > { %v517_v49 = vshrl.u32 %v1448_v0, %v502_v59  ;;  %v506_v31 = vor.u32 %v505_v15, %v504_v63  ;;  %v509_v36 = vor.u32 %v508_v41, %v507_v1  ;;  %v512_v53 = vor.u32 %v511_v12, %v510_v11 }
  0x69   : > { %v515_v45 = vor.u32 %v514_v38, %v513_v13  ;;  %vm478_vm6 = vcmp.lt.s32.totalorder %v1778_v43, 2  ;;  %v675_v26 = vxor.u32 2147483648, %v674_v17  ;;  %v345_v16 = vsub.s32 0, %v1805_v40 }
  0x6a   : > { %vm521_vm7 = vcmp.lt.s32.totalorder %v1786_v29, 3  ;;  %vm522_vm8 = vcmp.lt.s32.totalorder %v1786_v29, 4  ;;  %v684_v55 = vadd.s32 3, %v680_v23  ;;  %v1817_v19 = vshll.u32 %v495_v30, 8 }
  0x6b   : > { %v524_v20 = vsel %vm522_vm8, %v512_v53, 2102212464  ;;  %v528_v9 = vsel %vm522_vm8, %v515_v45, 920167782  ;;  %v676_v33 = vsel %vm593_vm14, %v675_v26, %v674_v17  ;;  %v1232_v34 = vmin.u32 %v345_v16, %v1805_v40 }
  0x6c   : > { %v518_v57 = vor.u32 %v517_v49, %v516_v44  ;;  %vm520_vm9 = vcmp.lt.s32.totalorder %v1786_v29, 2  ;;  %v1351_v21 = vpop.eup %1350  ;;  %vm475_vm10 = vweird.f32 %v1540_v14  ;;  %v679_v39 = vsel %vm1769_vm15, %v1562_v25, %v676_v33 }
  0x6d   : > { %v523_v27 = vsel %vm519_vm5, %v503_v32, %v506_v31  ;;  %v527_v59 = vsel %vm519_vm5, %v506_v31, %v509_v36  ;;  %v529_v60 = vsel %vm521_vm7, %v512_v53, %v528_v9  ;;  %v1353_v47 = vpop.eup %1352  ;;  %v483_v61 = vxor.u32 2147483648, %v1351_v21 }
  0x6e   : > { %1354 = vcosq.f32 %v679_v39  ;;  %vm281_vm11 = vcmp.lt.s32.totalorder %v1553_v22, 0  ;;  %v347_v62 = vclz %v1232_v34  ;;  %v525_v63 = vsel %vm521_vm7, %v509_v36, %v524_v20 }
  0x6f   : > { %v480_v2 = vxor.u32 2147483648, %v1353_v47  ;;  %1356 = vsinq.f32 %v679_v39  ;;  %v685_v1 = vand.u32 3, %v684_v55  ;;  %v531_v3 = vsel %vm519_vm5, %v509_v36, %v512_v53 }
  0x70   : > { %v335_v6 = vadd.s32 %v1746_v28, %v1738_v10  ;;  %v1233_v15 = vadd.s32 4294967294, %v347_v62  ;;  %v530_v41 = vsel %vm520_vm9, %v527_v59, %v529_v60  ;;  %v532_v11 = vsel %vm522_vm8, %v518_v57, 1326507024 }
  0x71   : > { %vm1846_vm12 = vcmp.le.f32.partialorder %v279_v42, 0.7853982  ;;  %v526_v18 = vsel %vm520_vm9, %v523_v27, %v525_v63  ;;  %v533_v23 = vsel %vm521_vm7, %v515_v45, %v532_v11  ;;  %v481_v24 = vsel %vm479_vm2, %v1351_v21, %v480_v2 }
  0x72   : > { %v1855_v10 = vmul.u32.u64.low %v1817_v19, %v530_v41  ;;  %v1856_v28 = vmul.u32.u64.high %v1817_v19, %v530_v41, %v1855_v10  ;;  %v484_v42 = vsel %vm482_vm4, %v483_v61, %v1353_v47  ;;  %vm1234_vm13 = vcmp.lt.s32.totalorder %v1233_v15, 0 }
  0x73   : > { %v534_v13 = vsel %vm520_vm9, %v531_v3, %v533_v23  ;;  %v350_v30 = vsel %vm1234_vm13, 0, %v1233_v15  ;;  %v365_v32 = vsub.s32 4, %v1790_v8  ;;  %vm683_vm14 = vweird.f32 %v1562_v25 }
  0x74   : > { %v1867_v38 = vmul.u32.u64.low %v1817_v19, %v534_v13  ;;  %v1868_v17 = vmul.u32.u64.high %v1817_v19, %v534_v13, %v1867_v38  ;;  %v351_v44 = vsub.s32 32, %v350_v30  ;;  %v352_v49 = vshll.u32 %v1805_v40, %v350_v30 }
  0x75   : > { %v355_v31 = vsub.s32 4294967266, %v350_v30  ;;  %v485_v36 = vsel %vm478_vm6, %v481_v24, %v484_v42  ;;  %v542_v53 = vmul.u32 %v1817_v19, %v526_v18  ;;  %v545_v29 = vadd.s32 1, %v1856_v28 }
  0x76   : > { %v802_v45 = vand.u32 2139095040, %v1759_v51  ;;  %vm686_vm15 = vcmp.lt.s32.totalorder %v685_v1, 2  ;;  %vm690_vm2 = vcmp.eq.s32.totalorder %v685_v1, 2  ;;  %v353_v26 = vshrl.u32 %v335_v6, %v351_v44 }
  0x77   : > { %v356_v16 = vadd.s32 127, %v355_v31  ;;  %v366_v55 = vsel %vm281_vm11, %v365_v32, %v1790_v8  ;;  %vm544_vm4 = vc.u32 %v1868_v17, %v1855_v10  ;;  %v799_v43 = vand.u32 2147483647, %v1759_v51 }
  0x78   : > { %v803_v40 = vshrl.u32 %v802_v45, 23  ;;  %v1355_v20 = vpop.eup %1354  ;;  %v486_v9 = vsel %vm475_vm10, nan, %v485_v36  ;;  %v354_v19 = vor.u32 %v353_v26, %v352_v49  ;;  %v546_v34 = vsel %vm544_vm4, %v545_v29, %v1856_v28 }
  0x79   : > { %v357_v33 = vshll.u32 %v356_v16, 23  ;;  %v1357_v57 = vpop.eup %1356  ;;  %vm687_vm5 = vcmp.eq.s32.totalorder %v685_v1, 0  ;;  %v691_v21 = vxor.u32 2147483648, %v1355_v20  ;;  %v547_v39 = vadd.s32 %v546_v34, %v542_v53 }
  0x7a   : > { %v1251_v27 = vadd.s32 4294967169, %v803_v40  ;;  %v688_v8 = vxor.u32 2147483648, %v1357_v57  ;;  %v361_v60 = vcvt.s32.f32 %v354_v19  ;;  %v368_v47 = vsel %vm1846_vm12, 0, %v366_v55 }
  0x7b   : > { %v358_v59 = vor.u32 4788187, %v357_v33  ;;  %v692_v61 = vsel %vm690_vm2, %v691_v21, %v1357_v57  ;;  %v910_v62 = vrot.slane %v486_v9, 5  ;;  %v548_v14 = vadd.s32 536870912, %v547_v39 }
  0x7c   : > { %v809_v63 = vadd.s32 1, %v1251_v27  ;;  %v689_v2 = vsel %vm687_vm5, %v1355_v20, %v688_v8  ;;  %v806_v6 = vand.u32 8388607, %v799_v43  ;;  %v1896_v15 = vsel %vm266_vm3, %v267_v46, %v269_v7 }
  0x7d   : > { %v359_v3 = vand.u32 2147483647, %v358_v59  ;;  %v693_v41 = vsel %vm686_vm15, %v689_v2, %v692_v61  ;;  %v372_v11 = vadd.s32 3, %v368_v47  ;;  %v549_v18 = vshrl.u32 %v548_v14, 30 }
  0x7e   : > { %vm810_vm6 = vcmp.gt.s32.totalorder %v809_v63, 0  ;;  %v1901_v23 = vsel %vm683_vm14, nan, %v693_v41  ;;  %v928_v5 = vsel %vm249_vm0, %v1535_v4, %v910_v62  ;;  %v698_v46 = vand.u32 2139095040, %v1896_v15 }
  0x7f   : > { %v362_v28 = vmul.f32 %v361_v60, %v359_v3  ;;  %v811_v24 = vsel %vm810_vm6, %v809_v63, 0  ;;  %v913_v42 = vrot.slane %v1901_v23, 5  ;;  %v550_v35 = vshll.u32 %v549_v18, 30 }
  0x80   : > { %v807_v1 = vor.u32 8388608, %v806_v6  ;;  %v813_v13 = vand.u32 31, %v811_v24  ;;  %v1910_v25 = vand.u32 3, %v372_v11  ;;  %vm489_vm3 = vcmp.lt.s32.totalorder %v1654_v37, 0 }
  0x81   : > { %v363_v7 = vxor.u32 2147483648, %v362_v28  ;;  %v914_v30 = vsel %vm249_vm0, %v910_v62, %v913_v42  ;;  %v543_v32 = vadd.s32 %v1855_v10, %v1868_v17  ;;  %v1915_v38 = vsub.s32 %v547_v39, %v550_v35 }
  0x82   : > { %v932_v4 = vpack.c.bf16 %v914_v30, %v928_v5  ;;  %v814_v49 = vsub.s32 32, %v813_v13  ;;  %v695_v31 = vand.u32 2147483647, %v1896_v15  ;;  %v1924_v29 = vshrl.u32 %v811_v24, 5 }
  0x83   : > { %v364_v44 = vsel %vm281_vm11, %v363_v7, %v362_v28  ;;  %v553_v53 = vsub.s32 0, %v1915_v38  ;;  %v699_v45 = vshrl.u32 %v698_v46, 23  ;;  %v816_v10 = vshll.u32 %v1443_v48, %v813_v13 }
  0x84   : > { %v367_v36 = vsel %vm1846_vm12, %v1553_v22, %v364_v44  ;;  %982 = vmatprep.subr.bf16.mxu0 %v932_v4  ;;  %v817_v17 = vshrl.u32 %v1444_v50, %v814_v49  ;;  %v819_v26 = vshll.u32 %v1444_v50, %v813_v13  ;;  %v1929_v16 = vshll.u32 %v807_v1, 8 }
  0x85   : > { %1358 = vcosq.f32 %v367_v36  ;;  %v1240_v55 = vmin.u32 %v553_v53, %v1915_v38  ;;  %v573_v40 = vsub.s32 4, %v549_v18  ;;  %v820_v12 = vshrl.u32 %v1445_v52, %v814_v49 }
  0x86   : > { %1360 = vsinq.f32 %v367_v36  ;;  %v822_v20 = vshll.u32 %v1445_v52, %v813_v13  ;;  %v823_v9 = vshrl.u32 %v1446_v54, %v814_v49  ;;  %v825_v19 = vshll.u32 %v1446_v54, %v813_v13 }
  0x87   : > { %vm1938_vm7 = vcmp.le.f32.partialorder %v487_v58, 0.7853982  ;;  %v555_v34 = vclz %v1240_v55  ;;  %vm831_vm8 = vcmp.lt.s32.totalorder %v1924_v29, 1  ;;  %v1247_v57 = vadd.s32 4294967169, %v699_v45 }
  0x88   : > { %v1945_v21 = vand.u32 8388607, %v695_v31  ;;  %v818_v39 = vor.u32 %v817_v17, %v816_v10  ;;  %v821_v27 = vor.u32 %v820_v12, %v819_v26  ;;  %v826_v8 = vshrl.u32 %v1447_v56, %v814_v49 }
  0x89   : > { %v828_v59 = vshll.u32 %v1447_v56, %v813_v13  ;;  %v1241_v60 = vadd.s32 4294967294, %v555_v34  ;;  %v815_v58 = vshrl.u32 %v1443_v48, %v814_v49  ;;  %v824_v47 = vor.u32 %v823_v9, %v822_v20 }
  0x8a   : > { %v829_v61 = vshrl.u32 %v1448_v0, %v814_v49  ;;  %v574_v62 = vsel %vm489_vm3, %v573_v40, %v549_v18  ;;  %v827_v14 = vor.u32 %v826_v8, %v825_v19  ;;  %vm832_vm9 = vcmp.lt.s32.totalorder %v1924_v29, 2 }
  0x8b   : > { %vm834_vm10 = vcmp.lt.s32.totalorder %v1924_v29, 4  ;;  %vm1242_vm11 = vcmp.lt.s32.totalorder %v1241_v60, 0  ;;  %vm833_vm12 = vcmp.lt.s32.totalorder %v1924_v29, 3  ;;  %vm375_vm13 = vcmp.eq.s32.totalorder %v1910_v25, 0 }
  0x8c   : > { %v830_v63 = vor.u32 %v829_v61, %v828_v59  ;;  %v836_v2 = vsel %vm834_vm10, %v824_v47, 2102212464  ;;  %v558_v3 = vsel %vm1242_vm11, 0, %v1241_v60  ;;  %v839_v6 = vsel %vm831_vm8, %v818_v39, %v821_v27 }
  0x8d   : > { %v840_v41 = vsel %vm834_vm10, %v827_v14, 920167782  ;;  %v705_v11 = vadd.s32 1, %v1247_v57  ;;  %v559_v18 = vsub.s32 32, %v558_v3  ;;  %v560_v28 = vshll.u32 %v1915_v38, %v558_v3 }
  0x8e   : > { %v563_v24 = vsub.s32 4294967266, %v558_v3  ;;  %v835_v5 = vsel %vm831_vm8, %v815_v58, %v818_v39  ;;  %v837_v35 = vsel %vm833_vm12, %v821_v27, %v836_v2  ;;  %v841_v46 = vsel %vm833_vm12, %v824_v47, %v840_v41 }
  0x8f   : > { %v843_v7 = vsel %vm831_vm8, %v821_v27, %v824_v47  ;;  %v844_v1 = vsel %vm834_vm10, %v830_v63, 1326507024  ;;  %v1359_v13 = vpop.eup %1358  ;;  %v561_v30 = vshrl.u32 %v543_v32, %v559_v18  ;;  %v842_v38 = vsel %vm832_vm9, %v839_v6, %v841_v46 }
  0x90   : > { %v564_v4 = vadd.s32 127, %v563_v24  ;;  %vm706_vm14 = vcmp.gt.s32.totalorder %v705_v11, 0  ;;  %v1361_v44 = vpop.eup %1360  ;;  %v576_v49 = vsel %vm1938_vm7, 0, %v574_v62  ;;  %v845_v36 = vsel %vm833_vm12, %v827_v14, %v844_v1 }
  0x91   : > { %v1981_v53 = vmul.u32.u64.low %v1929_v16, %v842_v38  ;;  %v1982_v45 = vmul.u32.u64.high %v1929_v16, %v842_v38, %v1981_v53  ;;  %v562_v10 = vor.u32 %v561_v30, %v560_v28  ;;  %v838_v32 = vsel %vm832_vm9, %v835_v5, %v837_v35 }
  0x92   : > { %v565_v17 = vshll.u32 %v564_v4, 23  ;;  %v846_v26 = vsel %vm832_vm9, %v843_v7, %v845_v36  ;;  %v379_v55 = vxor.u32 2147483648, %v1359_v13  ;;  %v707_v20 = vsel %vm706_vm14, %v705_v11, 0 }
  0x93   : > { %v1990_v40 = vmul.u32.u64.low %v1929_v16, %v846_v26  ;;  %v1991_v12 = vmul.u32.u64.high %v1929_v16, %v846_v26, %v1990_v40  ;;  %v376_v9 = vxor.u32 2147483648, %v1361_v44  ;;  %vm378_vm15 = vcmp.eq.s32.totalorder %v1910_v25, 2 }
  0x94   : > { %v566_v19 = vor.u32 4788187, %v565_v17  ;;  %v569_v34 = vcvt.s32.f32 %v562_v10  ;;  %v854_v57 = vmul.u32 %v1929_v16, %v838_v32  ;;  %v857_v39 = vadd.s32 1, %v1982_v45 }
  0x95   : > { %v708_v27 = vshrl.u32 %v707_v20, 5  ;;  %v709_v8 = vand.u32 31, %v707_v20  ;;  %v580_v29 = vadd.s32 3, %v576_v49  ;;  %v703_v60 = vor.u32 8388608, %v1945_v21 }
  0x96   : > { %v567_v59 = vand.u32 2147483647, %v566_v19  ;;  %v380_v58 = vsel %vm378_vm15, %v379_v55, %v1361_v44  ;;  %vm856_vm2 = vc.u32 %v1991_v12, %v1981_v53  ;;  %vm374_vm4 = vcmp.lt.s32.totalorder %v1910_v25, 2 }
  0x97   : > { %v710_v47 = vsub.s32 32, %v709_v8  ;;  %v712_v61 = vshll.u32 %v1443_v48, %v709_v8  ;;  %v377_v16 = vsel %vm375_vm13, %v1359_v13, %v376_v9  ;;  %v858_v14 = vsel %vm856_vm2, %v857_v39, %v1982_v45 }
  0x98   : > { %v570_v62 = vmul.f32 %v569_v34, %v567_v59  ;;  %v715_v63 = vshll.u32 %v1444_v50, %v709_v8  ;;  %v859_v2 = vadd.s32 %v858_v14, %v854_v57  ;;  %vm727_vm5 = vcmp.lt.s32.totalorder %v708_v27, 1 }
  0x99   : > { %v713_v21 = vshrl.u32 %v1444_v50, %v710_v47  ;;  %v716_v3 = vshrl.u32 %v1445_v52, %v710_v47  ;;  %v718_v41 = vshll.u32 %v1445_v52, %v709_v8  ;;  %v719_v11 = vshrl.u32 %v1446_v54, %v710_v47 }
  0x9a   : > { %v571_v6 = vxor.u32 2147483648, %v570_v62  ;;  %v721_v18 = vshll.u32 %v1446_v54, %v709_v8  ;;  %v860_v28 = vadd.s32 536870912, %v859_v2  ;;  %v711_v24 = vshrl.u32 %v1443_v48, %v710_v47 }
  0x9b   : > { %v714_v5 = vor.u32 %v713_v21, %v712_v61  ;;  %v722_v35 = vshrl.u32 %v1447_v56, %v710_v47  ;;  %v717_v50 = vor.u32 %v716_v3, %v715_v63  ;;  %v724_v7 = vshll.u32 %v1447_v56, %v709_v8 }
  0x9c   : > { %v572_v46 = vsel %vm489_vm3, %v571_v6, %v570_v62  ;;  %v725_v1 = vshrl.u32 %v1448_v0, %v710_v47  ;;  %v2019_v13 = vshrl.u32 %v860_v28, 30  ;;  %v720_v54 = vor.u32 %v719_v11, %v718_v41 }
  0x9d   : > { %v575_v52 = vsel %vm1938_vm7, %v1654_v37, %v572_v46  ;;  %v723_v30 = vor.u32 %v722_v35, %v721_v18  ;;  %vm729_vm6 = vcmp.lt.s32.totalorder %v708_v27, 3  ;;  %vm730_vm8 = vcmp.lt.s32.totalorder %v708_v27, 4 }
  0x9e   : > { %1362 = vcosq.f32 %v575_v52  ;;  %v726_v48 = vor.u32 %v725_v1, %v724_v7  ;;  %v862_v4 = vshll.u32 %v2019_v13, 30  ;;  %vm728_vm3 = vcmp.lt.s32.totalorder %v708_v27, 2 }
  0x9f   : > { %1364 = vsinq.f32 %v575_v52  ;;  %v732_v56 = vsel %vm730_vm8, %v720_v54, 2102212464  ;;  %v731_v0 = vsel %vm727_vm5, %v711_v24, %v714_v5  ;;  %v735_v38 = vsel %vm727_vm5, %v714_v5, %v717_v50 }
  0xa0   : > { %v736_v33 = vsel %vm730_vm8, %v723_v30, 920167782  ;;  %v743_v44 = vshll.u32 %v703_v60, 8  ;;  %v863_v49 = vsub.s32 %v859_v2, %v862_v4  ;;  %v733_v36 = vsel %vm729_vm6, %v717_v50, %v732_v56 }
  0xa1   : > { %v737_v45 = vsel %vm729_vm6, %v720_v54, %v736_v33  ;;  %v739_v10 = vsel %vm727_vm5, %v717_v50, %v720_v54  ;;  %vm371_vm7 = vweird.f32 %v1553_v22  ;;  %v581_v17 = vand.u32 3, %v580_v29  ;;  %v1378_v50 = vld [vmem:[%s1532_s6] sm:$0x77]  ;;  %s2112_s6 = scalar_lea.sflag [#allocation3], %s201_s29 }
  0xa2   : > { %v738_v32 = vsel %vm728_vm3, %v735_v38, %v737_v45  ;;  %v740_v26 = vsel %vm730_vm8, %v726_v48, 1326507024  ;;  %v381_v55 = vsel %vm374_vm4, %v377_v16, %v380_v58  ;;  %v865_v40 = vsub.s32 0, %v863_v49 }
  0xa3   : > { %v741_v20 = vsel %vm729_vm6, %v723_v30, %v740_v26  ;;  %v734_v9 = vsel %vm728_vm3, %v731_v0, %v733_v36  ;;  %v2037_v34 = vmul.u32.u64.low %v743_v44, %v738_v32  ;;  %v2038_v57 = vmul.u32.u64.high %v743_v44, %v738_v32, %v2037_v34 }
  0xa4   : > { %v742_v19 = vsel %vm728_vm3, %v739_v10, %v741_v20  ;;  %v1449_v39 = vmov 0   ;;  %v1252_v8 = vmin.u32 %v865_v40, %v863_v49  ;;  %v382_v29 = vsel %vm371_vm7, nan, %v381_v55 }
  0xa5   : > { %1014 = vmatprep.mubr.bf16.mxu0 %v1449_v39  ;;  %1122 = vmatprep.mubr.bf16.mxu1 %v1449_v39  ;;  %v2043_v59 = vmul.u32.u64.low %v743_v44, %v742_v19  ;;  %v2044_v25 = vmul.u32.u64.high %v743_v44, %v742_v19, %v2043_v59  ;;  %v750_v60 = vmul.u32 %v743_v44, %v734_v9  ;;  %vm579_vm9 = vweird.f32 %v1654_v37 }
  0xa6   : > { %1344 = vset.pattern.permute.xlu0 %v1449_v39  ;;  %v867_v27 = vclz %v1252_v8  ;;  %vm586_vm10 = vcmp.eq.s32.totalorder %v581_v17, 2  ;;  %v753_v47 = vadd.s32 1, %v2038_v57  ;;  %vm583_vm11 = vcmp.eq.s32.totalorder %v581_v17, 0 }
  0xa7   : > { %vm752_vm12 = vc.u32 %v2044_v25, %v2037_v34  ;;  %vm582_vm13 = vcmp.lt.s32.totalorder %v581_v17, 2  ;;  %v909_v22 = vrot.slane %v382_v29, 5  ;;  %v855_v21 = vadd.s32 %v1981_v53, %v1991_v12 }
  0xa8   : > { %v1363_v58 = vpop.eup %1362  ;;  %v1253_v62 = vadd.s32 4294967294, %v867_v27  ;;  %v754_v63 = vsel %vm752_vm12, %v753_v47, %v2038_v57  ;;  %v885_v33 = vsub.s32 4, %v2019_v13  ;;  %vm801_vm15 = vcmp.lt.s32.totalorder %v1759_v51, 0 }
  0xa9   : > { %v1365_v61 = vpop.eup %1364  ;;  %v587_v16 = vxor.u32 2147483648, %v1363_v58  ;;  %v755_v3 = vadd.s32 %v754_v63, %v750_v60  ;;  %v927_v7 = vsel %vm249_vm0, %v1378_v50, %v909_v22  ;;  %vm800_vm2 = vcmp.le.f32.partialorder %v799_v43, 0.7853982 }
  0xaa   : > { %v584_v14 = vxor.u32 2147483648, %v1365_v61  ;;  %vm1254_vm14 = vcmp.lt.s32.totalorder %v1253_v62, 0  ;;  %v886_v10 = vsel %vm801_vm15, %v885_v33, %v2019_v13  ;;  %v751_v20 = vadd.s32 %v2037_v34, %v2044_v25  ;;  %v1080_v33 = vld [vmem:[%s2169_s3] sm:$0x7] }
  0xab   : > { %v588_v2 = vsel %vm586_vm10, %v587_v16, %v1365_v61  ;;  %v870_v41 = vsel %vm1254_vm14, 0, %v1253_v62  ;;  %v756_v35 = vadd.s32 536870912, %v755_v3  ;;  %v888_v55 = vsel %vm800_vm2, 0, %v886_v10  ;;  %1083 = vperm.xlu0 %1344, %v1080_v33  }
  0xac   : > { %v585_v6 = vsel %vm583_vm11, %v1363_v58, %v584_v14  ;;  %v871_v18 = vsub.s32 32, %v870_v41  ;;  %v872_v28 = vshll.u32 %v863_v49, %v870_v41  ;;  %v875_v24 = vsub.s32 4294967266, %v870_v41 }
  0xad   : > { %v589_v11 = vsel %vm582_vm13, %v585_v6, %v588_v2  ;;  %v757_v12 = vshrl.u32 %v756_v35, 30  ;;  %v892_v9 = vadd.s32 3, %v888_v55  ;;  %vm891_vm3 = vweird.f32 %v1759_v51 }
  0xae   : > { %v2058_v5 = vsel %vm579_vm9, nan, %v589_v11  ;;  %v873_v1 = vshrl.u32 %v855_v21, %v871_v18  ;;  %v876_v53 = vadd.s32 127, %v875_v24  ;;  %vm697_vm7 = vcmp.lt.s32.totalorder %v1896_v15, 0 }
  0xaf   : > { %v911_v46 = vrot.slane %v2058_v5, 5  ;;  %v758_v4 = vshll.u32 %v757_v12, 30  ;;  %v893_v13 = vand.u32 3, %v892_v9  ;;  %v781_v34 = vsub.s32 4, %v757_v12  ;;  %v1348_v5 = vld [vmem:[%s2167_s1 + $0x10] sm:$0xff]  }
  0xb0   : > { %v874_v54 = vor.u32 %v873_v1, %v872_v28  ;;  %v877_v30 = vshll.u32 %v876_v53, 23  ;;  %vm696_vm9 = vcmp.le.f32.partialorder %v695_v31, 0.7853982  ;;  %vm787_vm13 = vweird.f32 %v1896_v15 }
  0xb1   : > { %v912_v52 = vsel %vm249_vm0, %v909_v22, %v911_v46  ;;  %v759_v0 = vsub.s32 %v755_v3, %v758_v4  ;;  %vm898_vm5 = vcmp.eq.s32.totalorder %v893_v13, 2  ;;  %vm895_vm6 = vcmp.eq.s32.totalorder %v893_v13, 0 }
  0xb2   : > { %v931_v48 = vpack.c.bf16 %v912_v52, %v927_v7  ;;  %v878_v37 = vor.u32 4788187, %v877_v30  ;;  %v881_v56 = vcvt.s32.f32 %v874_v54  ;;  %vm894_vm8 = vcmp.lt.s32.totalorder %v893_v13, 2 }
  0xb3   : > { %v761_v44 = vsub.s32 0, %v759_v0  ;;  %v782_v6 = vsel %vm697_vm7, %v781_v34, %v757_v12  ;;  %vm963_vm14 = vcmask 228352  }
  0xb4   : > { %983 = vmatpush1.bf16.msra.mxu0 %v931_v48  ;;  %v879_v38 = vand.u32 2147483647, %v878_v37  ;;  %v784_v24 = vsel %vm696_vm9, 0, %v782_v6 }
  0xb5   : > { %v1248_v36 = vmin.u32 %v761_v44, %v759_v0  ;;  %v788_v7 = vadd.s32 3, %v784_v24  ;;  %v1079_v24 = vld [vmem:[%s2168_s2] sm:$0x3] }
  0xb6   : > { %v882_v49 = vmul.f32 %v881_v56, %v879_v38  ;;  %v1346_v38 = vld [vmem:[%s2167_s1] sm:$0xff]  }
  0xb7   : > { %v763_v17 = vclz %v1248_v36  ;;  %v789_v31 = vand.u32 3, %v788_v7 }
  0xb8   : > { %v883_v45 = vxor.u32 2147483648, %v882_v49 }
  0xb9   : > { %v1249_v40 = vadd.s32 4294967294, %v763_v17  ;;  %vm794_vm10 = vcmp.eq.s32.totalorder %v789_v31, 2  ;;  %vm791_vm11 = vcmp.eq.s32.totalorder %v789_v31, 0  ;;  %vm790_vm12 = vcmp.lt.s32.totalorder %v789_v31, 2 }
  0xba   : > { %v884_v32 = vsel %vm801_vm15, %v883_v45, %v882_v49 }
  0xbb   : > { %v887_v26 = vsel %vm800_vm2, %v1759_v51, %v884_v32  ;;  %vm1250_vm4 = vcmp.lt.s32.totalorder %v1249_v40, 0 }
  0xbc   : > { %1366 = vcosq.f32 %v887_v26  ;;  %v766_v19 = vsel %vm1250_vm4, 0, %v1249_v40 }
  0xbd   : > { %1368 = vsinq.f32 %v887_v26  ;;  %v767_v57 = vsub.s32 32, %v766_v19  ;;  %v768_v8 = vshll.u32 %v759_v0, %v766_v19  ;;  %v771_v43 = vsub.s32 4294967266, %v766_v19 }
  0xbf   : > { %v769_v59 = vshrl.u32 %v751_v20, %v767_v57  ;;  %v772_v29 = vadd.s32 127, %v771_v43 }
  0xc1   : > { %v770_v27 = vor.u32 %v769_v59, %v768_v8  ;;  %v773_v60 = vshll.u32 %v772_v29, 23 }
  0xc3   : > { %v774_v58 = vor.u32 4788187, %v773_v60  ;;  %v777_v47 = vcvt.s32.f32 %v770_v27 }
  0xc5   : > { %v775_v14 = vand.u32 2147483647, %v774_v58 }
  0xc6   : > { %v1367_v61 = vpop.eup %1366 }
  0xc7   : > { %v1369_v16 = vpop.eup %1368  ;;  %v899_v62 = vxor.u32 2147483648, %v1367_v61  ;;  %v778_v63 = vmul.f32 %v777_v47, %v775_v14 }
  0xc8   : > { %v896_v25 = vxor.u32 2147483648, %v1369_v16 }
  0xc9   : > { %v900_v22 = vsel %vm898_vm5, %v899_v62, %v1369_v16  ;;  %v779_v3 = vxor.u32 2147483648, %v778_v63 }
  0xca   : > { %v897_v2 = vsel %vm895_vm6, %v1367_v61, %v896_v25 }
  0xcb   : > { %v901_v21 = vsel %vm894_vm8, %v897_v2, %v900_v22  ;;  %v780_v18 = vsel %vm697_vm7, %v779_v3, %v778_v63 }
  0xcc   : > { %v902_v41 = vsel %vm891_vm3, nan, %v901_v21  ;;  %v783_v28 = vsel %vm696_vm9, %v1896_v15, %v780_v18  ;;  %v1347_v15 = vld [vmem:[%s2167_s1 + $0x8] sm:$0xff]  }
  0xcd   : > { %v917_v11 = vrot.slane %v902_v41, 5  ;;  %1370 = vcosq.f32 %v783_v28 }
  0xce   : > { %1372 = vsinq.f32 %v783_v28 }
  0xcf   : > { %v918_v51 = vsel %vm249_vm0, %v913_v42, %v917_v11  ;;  %v930_v35 = vsel %vm249_vm0, %v917_v11, 1.0 }
  0xd0   : > { %v934_v50 = vpack.c.bf16 %v930_v35, %v918_v51 }
  0xd2   : > { %1259 = vmatprep.subr.msk.bf16.mxu0 %vm252_vm1, %v934_v50 }
  0xd7   : > { %v1371_v1 = vpop.eup %1370 }
  0xd8   : > { %v1373_v53 = vpop.eup %1372  ;;  %v795_v12 = vxor.u32 2147483648, %v1371_v1 }
  0xd9   : > { %v792_v52 = vxor.u32 2147483648, %v1373_v53 }
  0xda   : > { %v796_v23 = vsel %vm794_vm10, %v795_v12, %v1373_v53 }
  0xdb   : > { %v793_v42 = vsel %vm791_vm11, %v1371_v1, %v792_v52 }
  0xdc   : > { %v797_v54 = vsel %vm790_vm12, %v793_v42, %v796_v23 }
  0xdd   : > { %v798_v30 = vsel %vm787_vm13, nan, %v797_v54 }
  0xde   : > { %v915_v48 = vrot.slane %v798_v30, 5 }
  0xe0   : > { %v916_v4 = vsel %vm249_vm0, %v911_v46, %v915_v48  ;;  %v929_v37 = vsel %vm249_vm0, %v915_v48, 1.0  ;;  %v1349_v46 = vld [vmem:[%s2167_s1 + $0x18] sm:$0xff]   ;;  %vm1086_vm0 = vcmask 523264  }
  0xe1   : > { %v933_v56 = vpack.c.bf16 %v929_v37, %v916_v4 }
  0xe3   : > { %v977_v0 = vsel %vm252_vm1, %v933_v56, 0 }
  0xe4   : > { %985 = vmatpush1.bf16.msra.mxu0 %v977_v0 }
  0xe7   : > { %1260 = vmatmul.mubr.msk.bf16.vlgmr.msra.gmra.mrb[0].mxu0 %vm963_vm14, %v1346_v38 }
  0xe8   : > { %1024 = vmatprep.mubr.bf16.mxu0 %v1449_v39 }
  0xef   : > { %1261 = vmatmul.mubr.msk.bf16.gmra.mrb[4].mxu0 %vm963_vm14, %v1347_v15 }
  0xf0   : > { %1034 = vmatprep.mubr.bf16.mxu0 %v1449_v39 }
  0xf7   : > { %1262 = vmatmul.mubr.msk.bf16.gmra.mrb[8].mxu0 %vm963_vm14, %v1348_v5 }
  0xf8   : > { %1044 = vmatprep.mubr.bf16.mxu0 %v1449_v39 }
  0xff   : > { %1263 = vmatmul.mubr.msk.bf16.gmra.mrb[12].mxu0 %vm963_vm14, %v1349_v46 }
 0x12a   : > { %v1084_v51 = vpop.permute.xlu0 %1083 }
 0x1ba   : > { %v1016_v44 = vpop.f32.mrb[0].mxu0 }
 0x1bb   : > { %v1018_v49 = vpop.f32.mrb[1].mxu0  ;;  %v1055_v45 = vmax.f32 %v1016_v44, 0.0 }
 0x1bc   : > { %v1020_v36 = vpop.f32.mrb[2].mxu0  ;;  %v1056_v32 = vmax.f32 %v1018_v49, 0.0 }
 0x1bd   : > { %v1057_v10 = vmax.f32 %v1020_v36, 0.0  ;;  %v1022_v17 = vpop.f32.mrb[3].mxu0 }
 0x1be   : > { %v1058_v26 = vmax.f32 %v1022_v17, 0.0 }
 0x1bf   : > { %v1071_v55 = vpack.c.bf16 %v1057_v10, %v1055_v45 }
 0x1c0   : > { %v1072_v39 = vpack.c.bf16 %v1058_v26, %v1056_v32 }
 0x1c2   : > { %v1026_v40 = vpop.f32.mrb[4].mxu0  ;;  %1090 = vmatprep.subr.bf16.mxu1 %v1072_v39 }
 0x1c3   : > { %v1028_v20 = vpop.f32.mrb[5].mxu0  ;;  %1091 = vmatpush1.bf16.msra.mxu1 %v1071_v55  ;;  %v1059_v19 = vmax.f32 %v1026_v40, 0.0 }
 0x1c4   : > { %v1030_v9 = vpop.f32.mrb[6].mxu0  ;;  %v1060_v43 = vmax.f32 %v1028_v20, 0.0 }
 0x1c5   : > { %v1061_v57 = vmax.f32 %v1030_v9, 0.0  ;;  %v1032_v8 = vpop.f32.mrb[7].mxu0 }
 0x1c6   : > { %v1062_v59 = vmax.f32 %v1032_v8, 0.0 }
 0x1c7   : > { %v1073_v29 = vpack.c.bf16 %v1061_v57, %v1059_v19 }
 0x1c8   : > { %v1074_v13 = vpack.c.bf16 %v1062_v59, %v1060_v43 }
 0x1ca   : > { %v1036_v27 = vpop.f32.mrb[8].mxu0  ;;  %1092 = vmatprep.subr.bf16.mxu1 %v1074_v13 }
 0x1cb   : > { %v1038_v60 = vpop.f32.mrb[9].mxu0  ;;  %1093 = vmatpush1.bf16.msra.mxu1 %v1073_v29  ;;  %v1063_v47 = vmax.f32 %v1036_v27, 0.0 }
 0x1cc   : > { %v1040_v58 = vpop.f32.mrb[10].mxu0  ;;  %v1064_v62 = vmax.f32 %v1038_v60, 0.0 }
 0x1cd   : > { %v1065_v61 = vmax.f32 %v1040_v58, 0.0  ;;  %v1042_v16 = vpop.f32.mrb[11].mxu0 }
 0x1ce   : > { %v1066_v14 = vmax.f32 %v1042_v16, 0.0 }
 0x1cf   : > { %v1075_v34 = vpack.c.bf16 %v1065_v61, %v1063_v47 }
 0x1d0   : > { %v1076_v25 = vpack.c.bf16 %v1066_v14, %v1064_v62 }
 0x1d2   : > { %v1046_v22 = vpop.f32.mrb[12].mxu0  ;;  %1094 = vmatprep.subr.bf16.mxu1 %v1076_v25 }
 0x1d3   : > { %v1048_v63 = vpop.f32.mrb[13].mxu0  ;;  %1095 = vmatpush1.bf16.msra.mxu1 %v1075_v34  ;;  %v1067_v21 = vmax.f32 %v1046_v22, 0.0 }
 0x1d4   : > { %v1050_v2 = vpop.f32.mrb[14].mxu0  ;;  %v1068_v41 = vmax.f32 %v1048_v63, 0.0 }
 0x1d5   : > { %v1069_v3 = vmax.f32 %v1050_v2, 0.0  ;;  %v1052_v6 = vpop.f32.mrb[15].mxu0 }
 0x1d6   : > { %v1070_v11 = vmax.f32 %v1052_v6, 0.0 }
 0x1d7   : > { %v1077_v18 = vpack.c.bf16 %v1069_v3, %v1067_v21 }
 0x1d8   : > { %v1078_v28 = vpack.c.bf16 %v1070_v11, %v1068_v41 }
 0x1da   : > { %1096 = vmatprep.subr.bf16.mxu1 %v1078_v28 }
 0x1db   : > { %1097 = vmatpush1.bf16.msra.mxu1 %v1077_v18 }
 0x1de   : > { %1264 = vmatmul.mubr.msk.bf16.vlgmr.msra.gmra.mrb[0].mxu1 %vm1086_vm0, %v1079_v24 }
 0x2b1   : > { %v1124_v35 = vpop.f32.mrb[0].mxu1 }
 0x2b2   : > { %v1125_v50 = vadd.f32 %v1124_v35, %v1084_v51  ;;  %v1126_v7 = vpop.f32.mrb[1].mxu1 }
 0x2b3   : > { %v1127_v31 = vadd.f32 %v1126_v7, %v1084_v51  ;;  %v1128_v1 = vpop.f32.mrb[2].mxu1 }
 0x2b4   : > { %v1131_v53 = vmul.f32 0.5, %v1125_v50  ;;  %v1129_v12 = vpop.f32.mrb[3].mxu1 }
 0x2b5   : > { %v1132_v52 = vmul.f32 0.5, %v1127_v31 }
 0x2b6   : > { %1374 = vtanh.f32 %v1131_v53 }
 0x2b7   : > { %1376 = vtanh.f32 %v1132_v52 }
 0x2c0   : > { %v1375_v23 = vpop.eup %1374 }
 0x2c1   : > { %v1377_v42 = vpop.eup %1376  ;;  %v1135_v54 = vmul.f32 0.5, %v1375_v23 }
 0x2c2   : > { %v1136_v30 = vmul.f32 0.5, %v1377_v42  ;;  %1151 = sbr.rel (!%p1514_p5) target bundleno = 740 (0x2e4), region = 40 }
 0x2c3   : > { %v1137_v48 = vadd.f32 0.5, %v1135_v54 }
 0x2c4   : > { %v1138_v4 = vadd.f32 0.5, %v1136_v30 }
 0x2c6   : > { %v1141_v37 = vcombine.low %v1137_v48, %v1138_v4 }
 0x2c8   : > { %1143 = vst [vmem:[%s203_s5] sm:$0x77] %v1141_v37 }
 0x2c9   : > { %s2186_s7 = smov (!%p1154_p11, %s1153_s7), 2 }
 0x2ca   : > { %s2117_s8 = sshll.u32 %s2186_s7, 6 }
 0x2cb   : > { %s1158_s9 = ssub.s32 128, %s2117_s8 }
 0x2cc   : > { %1159 = vsyncadd %s2112_s6, %s1158_s9  ;;  %p1268_p12 = scmp.ne.s32.totalorder %s2117_s8, 0  ;;  %s1274_s10 = sshll.u32 %s1497_s19, 7 }
 0x2cd   : > { %s2126_s25 = scalar_lea.hbm %s2170_s4, %s1274_s10  ;;  %s1165_s13 = sshll.u32 %s203_s5, 4  ;;  %s1166_s13 = int_to_ptr.vmem [resolvable:$true] %s1165_s13 }
 0x2ce   : > { %s1379_s27 = scalar_lea.vmem %s1166_s13, %s2117_s8  ;;  %s1450_s14 = smov [#allocation2]  }
 0x2cf   : > { %p1380_p13 = scmp.ne.s32.totalorder %s1166_s13, %s1379_s27  ;;  %s1383_s20 = sshll.u32 %s1450_s14, 4  ;;  %s1384_s20 = int_to_ptr.vmem [resolvable:$false] %s1383_s20 }
 0x2d0   : > { %s1385_s22 = scalar_lea.vmem %s1384_s20, 256  ;;  %p1386_p2 = scmp.lt.s32.totalorder %s1166_s13, %s1384_s20 }
 0x2d1   : > { %p1381_p0 = pnand %p1380_p13, %p1268_p12  ;;  %p1387_p3 = scmp.lt.s32.totalorder %s1385_s22, %s1379_s27 }
 0x2d3   : > { %p1382_p1 = pneg %p1381_p0  ;;  %p1388_p4 = por %p1387_p3, %p1386_p2 }
 0x2d5   : > { %p1389_p5 = pnand %p1388_p4, %p1382_p1 }
 0x2d7   : > { %1392 = shalt.err (!%p1389_p5)
}
 0x2d8   : > { %s1393_s19 = scalar_lea.hbm %s2126_s25, %s2117_s8  ;;  %s1397_s29 = scalar_lea.hbm %s2170_s4, 192 }
 0x2d9   : > { %p1394_p7 = scmp.ne.s32.totalorder %s2126_s25, %s1393_s19  ;;  %p1398_p10 = scmp.lt.u32.totalorder %s2126_s25, %s2170_s4 }
 0x2da   : > { %p1399_p11 = scmp.lt.u32.totalorder %s1397_s29, %s1393_s19  ;;  %p1401_p0 = scmp.lt.u32.totalorder %s1393_s19, %s2126_s25 }
 0x2db   : > { %p1395_p8 = pnand %p1394_p7, %p1268_p12 }
 0x2dc   : > { %p1400_p13 = por %p1399_p11, %p1398_p10 }
 0x2dd   : > { %p1396_p9 = pneg %p1395_p8 }
 0x2de   : > { %p1402_p1 = por %p1401_p0, %p1400_p13 }
 0x2e0   : > { %p1403_p2 = pnand %p1402_p1, %p1396_p9 }
 0x2e2   : > { %1406 = shalt.err (!%p1403_p2)
}
 0x2e3   : > { %1168 = dma.vmem_to_hbm [thread:$0]  (%p1268_p12), %s1166_s13, %s2117_s8, %s2126_s25, %s2112_s6  }
 0x2e4 PF: > { %p1304_p3 = scmp.ge.s32.totalorder %s1441_s18, 2  ;;  %s1177_s7 = sand.u32 1, %s1429_s15  }
 0x2e5   : > { %s1178_s9 = scalar_lea.sflag [#allocation3], %s1177_s7 }
 0x2e6   : > { %p1301_p4 = pnand %p1304_p3, %p1518_p6 }
 0x2e8   : > { %1424 = dma.done.wait (!%p1301_p4), %s1178_s9, 128  }
 0x2e9   : > { %1426 = vsyncadd (!%p1301_p4), %s1178_s9, 4294967168  ;;  %p14_p5 = scmp.ge.s32.totalorder %s1501_s21, 4   ;;  %s2181_s15 = smov %s1433_s16 }
 0x2ea   : > { %s2182_s16 = smov %s1437_s17  ;;  %s2183_s17 = smov %s1512_s24 }
 0x2eb   : > { %s2184_s18 = smov %s1501_s21  ;;  %16 = sbr.rel (!%p14_p5) target bundleno = 3 (0x3), region = 71 }
 0x2f2   :  { %1183 = vsyncpa [#allocation3], 1 }
 0x2f3   :  { %1185 = vsyncpa [#allocation3 + $0x1], 1 }

</bundles_post_ra>
